<compile_context>
chip_gen: v5e
topology: v5e:2x2
jax: 0.10.0
libtpu: 0.0.40
codegen_flags: <defaults>
</compile_context>

<pallas_src>
import jax
import jax.numpy as jnp
from jax.experimental import pallas as pl
from jax.experimental.pallas import tpu as pltpu


def _round_up(x, m):
    return ((x + m - 1) // m) * m


def _critic_kernel(x_ref, w1_ref, b1_ref, w2_ref, b2_ref, out_ref):
    # x_ref : (in_dim, tb) f32   -- batch on the lane axis
    # w1_ref: (H, in_dim) f32    -- PyTorch layout, resident
    # b1_ref: (H, 1) f32         -- broadcast along lanes
    # w2_ref: (1, H) f32
    # b2_ref: (1, 1) f32 in SMEM
    # out_ref: (1, tb) f32       -- lane-dense output slab
    h = jnp.dot(w1_ref[...], x_ref[...], preferred_element_type=jnp.float32) + b1_ref[...]
    h = jnp.maximum(h, 0.0)  # ReLU (VPU)
    out_ref[...] = (
        jnp.dot(w2_ref[...], h, preferred_element_type=jnp.float32) + b2_ref[0, 0]
    )


def critic_forward(obs, actions, params, *, block_batch=4096):
    """obs: [B, obs_dim] f32, actions: [B, act_dim] f32 -> [B, 1] f32."""
    w1, b1_col, w2_row, b2 = params
    B = obs.shape[0]
    obs_dim = obs.shape[1]
    act_dim = actions.shape[1]
    in_dim = obs_dim + act_dim
    H = w1.shape[0]

    # Fused concat + transpose (single XLA op): (in_dim, B), batch on the lane axis.
    xT = jnp.concatenate([obs.T, actions.T], axis=0)

    # Lane-dense tile: multiple of 128.  Cap at ceil(B/2) so the grid has >=2 steps and
    # both v7x TensorCores get work (harmless on single-TC v5e/v6e).
    tb = max(128, min(_round_up(block_batch, 128), _round_up(pl.cdiv(B, 2), 128)))
    Bp = _round_up(B, tb)
    if Bp != B:
        xT = jnp.pad(xT, ((0, 0), (0, Bp - B)))

    grid = (Bp // tb,)
    out = pl.pallas_call(
        _critic_kernel,
        out_shape=jax.ShapeDtypeStruct((1, Bp), jnp.float32),
        grid=grid,
        in_specs=[
            pl.BlockSpec((in_dim, tb), lambda i: (0, i)),          # x^T tile (streamed)
            pl.BlockSpec((H, in_dim), lambda i: (0, 0)),           # W1 (resident)
            pl.BlockSpec((H, 1), lambda i: (0, 0)),                # b1 column (resident)
            pl.BlockSpec((1, H), lambda i: (0, 0)),                # W2 row (resident)
            pl.BlockSpec((1, 1), lambda i: (0, 0),
                         memory_space=pltpu.MemorySpace.SMEM),     # b2 scalar (SMEM)
        ],
        out_specs=pl.BlockSpec((1, tb), lambda i: (0, i)),          # lane-dense output
        compiler_params=pltpu.CompilerParams(
            dimension_semantics=("parallel",)),
    )(xT, w1, b1_col, w2_row, b2)

    return out[0, :B, None]  # (B, 1)


def init_critic_params(key, obs_dim, act_dim, hidden=128):
    """Deterministic init matching nn.Linear shapes/layout (uniform +-1/sqrt(fan_in))."""
    in_dim = obs_dim + act_dim
    k1, k2, k3, k4 = jax.random.split(key, 4)
    lim1 = 1.0 / jnp.sqrt(in_dim)
    lim2 = 1.0 / jnp.sqrt(hidden)
    w1 = jax.random.uniform(k1, (hidden, in_dim), jnp.float32, -lim1, lim1)   # (H, in_dim)
    b1 = jax.random.uniform(k2, (hidden, 1), jnp.float32, -lim1, lim1)        # (H, 1)
    w2 = jax.random.uniform(k3, (1, hidden), jnp.float32, -lim2, lim2)        # (1, H)
    b2 = jax.random.uniform(k4, (1, 1), jnp.float32, -lim2, lim2)             # (1, 1)
    return (w1, b1, w2, b2)


def _reference(obs, actions, params):
    """Pure-JAX reference: concat -> linear -> relu -> linear (f32)."""
    w1, b1_col, w2_row, b2 = params
    x = jnp.concatenate([obs, actions], axis=1)
    h = jnp.maximum(x @ w1.T + b1_col[:, 0], 0.0)
    return h @ w2_row.T + b2[0, 0]


if __name__ == "__main__":
    OBS_DIM, ACT_DIM, HIDDEN = 16, 8, 128

    key = jax.random.PRNGKey(0)
    k_obs, k_act, k_params = jax.random.split(key, 3)
    params = init_critic_params(k_params, OBS_DIM, ACT_DIM, HIDDEN)

    ok = True
    # B=8: single tile.  B=300: two grid steps + padded tail columns.
    for B in (8, 300):
        ko, ka = jax.random.split(jax.random.fold_in(k_obs, B))
        obs = jax.random.normal(ko, (B, OBS_DIM), jnp.float32)
        actions = jax.random.normal(ka, (B, ACT_DIM), jnp.float32)

        out = critic_forward(obs, actions, params)
        jax.block_until_ready(out)
        assert out.shape == (B, 1)

        ref = _reference(obs, actions, params)
        ok &= bool(jnp.allclose(out, ref, atol=1e-3, rtol=1e-3))

    assert ok, "mismatch vs reference"
    print("KERNEL_OK")
</pallas_src>

<mosaic_0001>
module attributes {stable_mosaic.version = 11 : i64} {
  func.func @_critic_kernel(%arg0: i32, %arg1: memref<24x128xf32, #tpu.memory_space<vmem>>, %arg2: memref<128x24xf32, #tpu.memory_space<vmem>>, %arg3: memref<128x1xf32, #tpu.memory_space<vmem>>, %arg4: memref<1x128xf32, #tpu.memory_space<vmem>>, %arg5: memref<1x1xf32, #tpu.memory_space<smem>>, %arg6: memref<1x128xf32, #tpu.memory_space<vmem>>) attributes {dimension_semantics = [#tpu.dimension_semantics<parallel>], iteration_bounds = array<i64: 1>, scalar_prefetch = 0 : i64, scratch_operands = 0 : i64, tpu.core_type = #tpu.core_type<tc>, window_params = [{transform_indices = @transform_0, window_bounds = array<i64: 24, 128>}, {pipeline_mode = #tpu.pipeline_mode<synchronous>, transform_indices = @transform_1, window_bounds = array<i64: 128, 24>}, {pipeline_mode = #tpu.pipeline_mode<synchronous>, transform_indices = @transform_2, window_bounds = array<i64: 128, 1>}, {pipeline_mode = #tpu.pipeline_mode<synchronous>, transform_indices = @transform_3, window_bounds = array<i64: 1, 128>}, {transform_indices = @transform_4, window_bounds = array<i64: 1, 1>}, {transform_indices = @transform_5, window_bounds = array<i64: 1, 128>}]} {
    %c0 = arith.constant 0 : index
    %c0_0 = arith.constant 0 : index
    %0 = vector.load %arg2[%c0, %c0_0] : memref<128x24xf32, #tpu.memory_space<vmem>>, vector<128x24xf32>
    %c0_1 = arith.constant 0 : index
    %c0_2 = arith.constant 0 : index
    %1 = vector.load %arg1[%c0_1, %c0_2] : memref<24x128xf32, #tpu.memory_space<vmem>>, vector<24x128xf32>
    %cst = arith.constant dense<0.000000e+00> : vector<128x128xf32>
    %2 = tpu.matmul %0, %1, %cst {dimension_numbers = #tpu.dot_dimension_numbers<[1], [0], [0], [1], [0, 0, 1, 1], [], []>} : vector<128x24xf32>, vector<24x128xf32>, vector<128x128xf32> -> vector<128x128xf32>
    %c0_3 = arith.constant 0 : index
    %c0_4 = arith.constant 0 : index
    %3 = vector.load %arg3[%c0_3, %c0_4] : memref<128x1xf32, #tpu.memory_space<vmem>>, vector<128x1xf32>
    %4 = vector.broadcast %3 : vector<128x1xf32> to vector<128x128xf32>
    %5 = arith.addf %2, %4 : vector<128x128xf32>
    %cst_5 = arith.constant 0.000000e+00 : f32
    %6 = vector.broadcast %cst_5 : f32 to vector<128x128xf32>
    %7 = arith.maximumf %5, %6 : vector<128x128xf32>
    %c0_6 = arith.constant 0 : index
    %c0_7 = arith.constant 0 : index
    %8 = vector.load %arg4[%c0_6, %c0_7] : memref<1x128xf32, #tpu.memory_space<vmem>>, vector<1x128xf32>
    %cst_8 = arith.constant dense<0.000000e+00> : vector<1x128xf32>
    %9 = tpu.matmul %8, %7, %cst_8 {dimension_numbers = #tpu.dot_dimension_numbers<[1], [0], [0], [1], [0, 0, 1, 1], [], []>} : vector<1x128xf32>, vector<128x128xf32>, vector<1x128xf32> -> vector<1x128xf32>
    %c0_9 = arith.constant 0 : index
    %c0_10 = arith.constant 0 : index
    %10 = memref.load %arg5[%c0_9, %c0_10] : memref<1x1xf32, #tpu.memory_space<smem>>
    %11 = vector.broadcast %10 : f32 to vector<1x128xf32>
    %12 = arith.addf %9, %11 : vector<1x128xf32>
    %c0_11 = arith.constant 0 : index
    %c0_12 = arith.constant 0 : index
    %13 = vector.load %arg6[%c0_11, %c0_12] : memref<1x128xf32, #tpu.memory_space<vmem>>, vector<1x128xf32>
    tpu.vector_store %arg6[%c0_11, %c0_12], %12 {strides = array<i32>} : memref<1x128xf32, #tpu.memory_space<vmem>>, vector<1x128xf32>,
    return
  }
  func.func @transform_0(%arg0: i32) -> (i32, i32) {
    %c0_i32 = arith.constant 0 : i32
    %c0_i32_0 = arith.constant 0 : i32
    return %c0_i32, %arg0 : i32, i32
  }
  func.func @transform_1(%arg0: i32) -> (i32, i32) {
    %c0_i32 = arith.constant 0 : i32
    %c0_i32_0 = arith.constant 0 : i32
    %c0_i32_1 = arith.constant 0 : i32
    return %c0_i32, %c0_i32_0 : i32, i32
  }
  func.func @transform_2(%arg0: i32) -> (i32, i32) {
    %c0_i32 = arith.constant 0 : i32
    %c0_i32_0 = arith.constant 0 : i32
    %c0_i32_1 = arith.constant 0 : i32
    return %c0_i32, %c0_i32_0 : i32, i32
  }
  func.func @transform_3(%arg0: i32) -> (i32, i32) {
    %c0_i32 = arith.constant 0 : i32
    %c0_i32_0 = arith.constant 0 : i32
    %c0_i32_1 = arith.constant 0 : i32
    return %c0_i32, %c0_i32_0 : i32, i32
  }
  func.func @transform_4(%arg0: i32) -> (i32, i32) {
    %c0_i32 = arith.constant 0 : i32
    %c0_i32_0 = arith.constant 0 : i32
    %c0_i32_1 = arith.constant 0 : i32
    return %c0_i32, %c0_i32_0 : i32, i32
  }
  func.func @transform_5(%arg0: i32) -> (i32, i32) {
    %c0_i32 = arith.constant 0 : i32
    %c0_i32_0 = arith.constant 0 : i32
    return %c0_i32, %arg0 : i32, i32
  }
}

</mosaic_0001>

<bundles_post_ra>
// kernel: tpu_custom_call.1
= control target key start
LH: loop header
LB: loop body
LE: loop exit
PB: predicated region body
PF: predicated region fallthrough
CT: control target
= control target key end

     0   :  { %v360_v4 = vmov 0   ;;  %vm137_vm0 = vcmask 195584   ;;  %s525_s0 = inlined_call_operand.vmem [shape: f32[24,128], index: 0, kind: input, shape index: {}]   ;;  %s526_s1 = inlined_call_operand.vmem [shape: f32[128,24], index: 1, kind: input, shape index: {}]   ;;  %s527_s2 = inlined_call_operand.vmem [shape: f32[128,1], index: 2, kind: input, shape index: {}]   ;;  %s528_s3 = inlined_call_operand.vmem [shape: f32[1,128], index: 3, kind: input, shape index: {}]   ;;  %s529_s4 = inlined_call_operand.<no memory space> [shape: f32[1,1], index: 4, kind: input, shape index: {}]   ;;  %s530_s5 = inlined_call_operand.hbm [shape: f32[1,128], index: 5, kind: output, shape index: {}]  }
   0x1   :  { %v40_v0 = vld [vmem:[%s525_s0 + $0x10] sm:$0xff]  ;;  %v39_v1 = vld [vmem:[%s525_s0 + $0x8] sm:$0xff]  ;;  %v56_v2 = vld [vmem:[%s527_s2 + $0x78] sm:$0xff]  ;;  %331 = vset.pattern.permute.xlu0 %v360_v4  ;;  %332 = vset.pattern.permute.xlu1 %v360_v4 }
   0x2   :  { %323 = vmatpush.msra.mxu2 %v40_v0  ;;  %324 = vmatpush.msra.mxu3 %v40_v0  ;;  %v38_v3 = vld [vmem:[%s525_s0] sm:$0xff]  ;;  %v27_v5 = vld [vmem:[%s526_s1 + $0x28] sm:$0xff]  ;;  %v32_v6 = vld [vmem:[%s526_s1 + $0x50] sm:$0xff] }
   0x3   :  { %199 = vmatpush.msra.mxu0 %v40_v0  ;;  %134 = vperm.xlu0 %331, %v56_v2   ;;  %v22_v7 = vld [vmem:[%s526_s1] sm:$0xff]  ;;  %v54_v8 = vld [vmem:[%s527_s2 + $0x68] sm:$0xff]  ;;  %v52_v9 = vld [vmem:[%s527_s2 + $0x58] sm:$0xff] }
   0x4   :  { %325 = vmatpush.msra.mxu2 %v39_v1  ;;  %326 = vmatpush.msra.mxu3 %v39_v1  ;;  %v55_v10 = vld [vmem:[%s527_s2 + $0x70] sm:$0xff] }
   0x5   :  { %200 = vmatpush.msra.mxu0 %v39_v1  ;;  %124 = vperm.xlu1 %332, %v54_v8  }
   0x6   :  { %327 = vmatpush.msra.mxu2 %v38_v3  ;;  %328 = vmatpush.msra.mxu3 %v38_v3 }
   0x7   :  { %312 = vmatmul.msk.f32.vlgmr.msra.gmra.mxu2 %vm137_vm0, %v27_v5  ;;  %317 = vmatmul.msk.f32.vlgmr.msra.gmra.mxu3 %vm137_vm0, %v32_v6 }
   0x8   :  { %201 = vmatpush.msra.mxu0 %v38_v3  ;;  %333 = vset.pattern.permute.xlu2 %v360_v4 }
   0x9   :  { %307 = vmatmul.msk.f32.vlgmr.msra.gmra.mxu0 %vm137_vm0, %v22_v7 }
   0xa   :  { %11 = vsyncpa [#allocation4], 0  ;;  %114 = vperm.xlu2 %333, %v52_v9   ;;  %v28_v11 = vld [vmem:[%s526_s1 + $0x30] sm:$0xff]  ;;  %v33_v12 = vld [vmem:[%s526_s1 + $0x58] sm:$0xff]  ;;  %s361_s12 = smov [#allocation3]   ;;  %s298_s16 = sshll.u32 %s530_s5, 4  ;;  %s299_s16 = int_to_ptr.hbm [resolvable:$true] %s298_s16 }
   0xb   :  { %129 = vperm.xlu0 %331, %v55_v10   ;;  %v23_v13 = vld [vmem:[%s526_s1 + $0x8] sm:$0xff]  ;;  %v53_v14 = vld [vmem:[%s527_s2 + $0x60] sm:$0xff]  ;;  %v51_v15 = vld [vmem:[%s527_s2 + $0x50] sm:$0xff]  ;;  %s296_s13 = sshll.u32 %s361_s12, 4  ;;  %s297_s13 = int_to_ptr.vmem [resolvable:$true] %s296_s13 }
   0xc   :  { %v50_v16 = vld [vmem:[%s527_s2 + $0x48] sm:$0xff]  ;;  %v29_v17 = vld [vmem:[%s526_s1 + $0x38] sm:$0xff]  ;;  %v34_v18 = vld [vmem:[%s526_s1 + $0x60] sm:$0xff] }
   0xd   :  { %119 = vperm.xlu1 %332, %v53_v14   ;;  %v24_v19 = vld [vmem:[%s526_s1 + $0x10] sm:$0xff]  ;;  %v49_v20 = vld [vmem:[%s527_s2 + $0x40] sm:$0xff]  ;;  %v48_v21 = vld [vmem:[%s527_s2 + $0x38] sm:$0xff] }
   0xe   :  { %v47_v22 = vld [vmem:[%s527_s2 + $0x30] sm:$0xff]  ;;  %v30_v23 = vld [vmem:[%s526_s1 + $0x40] sm:$0xff]  ;;  %v35_v24 = vld [vmem:[%s526_s1 + $0x68] sm:$0xff] }
   0xf   :  { %313 = vmatmul.msk.f32.gmra.mxu2 %vm137_vm0, %v28_v11  ;;  %318 = vmatmul.msk.f32.gmra.mxu3 %vm137_vm0, %v33_v12  ;;  %v25_v25 = vld [vmem:[%s526_s1 + $0x18] sm:$0xff]  ;;  %v46_v26 = vld [vmem:[%s527_s2 + $0x28] sm:$0xff]  ;;  %v45_v27 = vld [vmem:[%s527_s2 + $0x20] sm:$0xff] }
  0x10   :  { %v44_v28 = vld [vmem:[%s527_s2 + $0x18] sm:$0xff]  ;;  %v31_v29 = vld [vmem:[%s526_s1 + $0x48] sm:$0xff]  ;;  %v36_v30 = vld [vmem:[%s526_s1 + $0x70] sm:$0xff] }
  0x11   :  { %308 = vmatmul.msk.f32.gmra.mxu0 %vm137_vm0, %v23_v13  ;;  %v26_v31 = vld [vmem:[%s526_s1 + $0x20] sm:$0xff]  ;;  %v43_v32 = vld [vmem:[%s527_s2 + $0x10] sm:$0xff]  ;;  %v42_v33 = vld [vmem:[%s527_s2 + $0x8] sm:$0xff] }
  0x12   :  { %109 = vperm.xlu2 %333, %v51_v15   ;;  %v41_v34 = vld [vmem:[%s527_s2] sm:$0xff]  ;;  %v37_v35 = vld [vmem:[%s526_s1 + $0x78] sm:$0xff] }
  0x13   :  { %104 = vperm.xlu0 %331, %v50_v16  }
  0x15   :  { %99 = vperm.xlu1 %332, %v49_v20  }
  0x17   :  { %314 = vmatmul.msk.f32.gmra.mxu2 %vm137_vm0, %v29_v17  ;;  %319 = vmatmul.msk.f32.gmra.mxu3 %vm137_vm0, %v34_v18 }
  0x19   :  { %309 = vmatmul.msk.f32.gmra.mxu0 %vm137_vm0, %v24_v19 }
  0x1a   :  { %94 = vperm.xlu2 %333, %v48_v21  }
  0x1b   :  { %89 = vperm.xlu0 %331, %v47_v22  }
  0x1d   :  { %84 = vperm.xlu1 %332, %v46_v26  }
  0x1f   :  { %315 = vmatmul.msk.f32.gmra.mxu2 %vm137_vm0, %v30_v23  ;;  %320 = vmatmul.msk.f32.gmra.mxu3 %vm137_vm0, %v35_v24 }
  0x21   :  { %310 = vmatmul.msk.f32.gmra.mxu0 %vm137_vm0, %v25_v25 }
  0x22   :  { %79 = vperm.xlu2 %333, %v45_v27  }
  0x23   :  { %74 = vperm.xlu0 %331, %v44_v28  }
  0x25   :  { %69 = vperm.xlu1 %332, %v43_v32  }
  0x27   :  { %316 = vmatmul.msk.f32.gmra.mxu2 %vm137_vm0, %v31_v29  ;;  %321 = vmatmul.msk.f32.gmra.mxu3 %vm137_vm0, %v36_v30 }
  0x29   :  { %311 = vmatmul.msk.f32.gmra.mxu0 %vm137_vm0, %v26_v31 }
  0x2a   :  { %64 = vperm.xlu2 %333, %v42_v33  }
  0x2b   :  { %59 = vperm.xlu0 %331, %v41_v34  }
  0x2f   :  { %322 = vmatmul.msk.f32.gmra.mxu3 %vm137_vm0, %v37_v35 }
  0x64   :  { %v115_v45 = vpop.permute.xlu2 %114 }
  0x6c   :  { %v110_v51 = vpop.permute.xlu2 %109 }
  0x74   :  { %v95_v61 = vpop.permute.xlu2 %94 }
  0x75   :  { %v135_v39 = vpop.permute.xlu0 %134 }
  0x77   :  { %v125_v43 = vpop.permute.xlu1 %124 }
  0x7c   :  { %v80_v12 = vpop.permute.xlu2 %79 }
  0x7d   :  { %v130_v46 = vpop.permute.xlu0 %129 }
  0x7f   :  { %v120_v50 = vpop.permute.xlu1 %119 }
  0x84   :  { %v65_v26 = vpop.permute.xlu2 %64 }
  0x85   :  { %v105_v52 = vpop.permute.xlu0 %104 }
  0x86   :  { %v513_v41 = vpop.f32.mrf.mxu0 }
  0x87   :  { %v100_v60 = vpop.permute.xlu1 %99 }
  0x8a   :  { %v233_v36 = vpop.f32.mrf.mxu3  ;;  %v218_v37 = vpop.f32.mrf.mxu2 }
  0x8b   :  { %v234_v5 = vadd.f32 %v233_v36, %v110_v51  ;;  %v267_v36 = vld [vmem:[%s528_s3] sm:$0x1] }
  0x8d   :  { %v90_v0 = vpop.permute.xlu0 %89  ;;  %v261_v9 = vmax.f32 %v234_v5, 0.0 }
  0x8e   :  { %v206_v47 = vpop.f32.mrf.mxu0 }
  0x8f   :  { %v85_v11 = vpop.permute.xlu1 %84  ;;  %v207_v31 = vadd.f32 %v206_v47, %v65_v26 }
  0x90   :  { %v219_v20 = vadd.f32 %v218_v37, %v85_v11  ;;  %v269_v37 = vstv %s529_s4 }
  0x91   :  { %v252_v34 = vmax.f32 %v207_v31, 0.0 }
  0x92   :  { %v236_v38 = vpop.f32.mrf.mxu3  ;;  %v221_v42 = vpop.f32.mrf.mxu2  ;;  %v256_v24 = vmax.f32 %v219_v20, 0.0 }
  0x93   :  { %v237_v1 = vadd.f32 %v236_v38, %v115_v45  ;;  %v222_v16 = vadd.f32 %v221_v42, %v90_v0 }
  0x95   :  { %v262_v7 = vmax.f32 %v237_v1, 0.0  ;;  %v75_v15 = vpop.permute.xlu0 %74  ;;  %v257_v21 = vmax.f32 %v222_v16, 0.0 }
  0x96   :  { %v209_v53 = vpop.f32.mrf.mxu0 }
  0x97   :  { %v70_v23 = vpop.permute.xlu1 %69 }
  0x98   :  { %v210_v27 = vadd.f32 %v209_v53, %v70_v23 }
  0x9a   :  { %v239_v40 = vpop.f32.mrf.mxu3  ;;  %v224_v48 = vpop.f32.mrf.mxu2  ;;  %v253_v33 = vmax.f32 %v210_v27, 0.0 }
  0x9b   :  { %v240_v62 = vadd.f32 %v239_v40, %v120_v50  ;;  %v225_v13 = vadd.f32 %v224_v48, %v95_v61 }
  0x9d   :  { %v263_v6 = vmax.f32 %v240_v62, 0.0  ;;  %v258_v19 = vmax.f32 %v225_v13, 0.0  ;;  %v60_v29 = vpop.permute.xlu0 %59 }
  0x9e   :  { %v212_v3 = vpop.f32.mrf.mxu0  ;;  %v204_v32 = vadd.f32 %v513_v41, %v60_v29 }
  0x9f   :  { %v213_v25 = vadd.f32 %v212_v3, %v75_v15 }
  0xa0   :  { %v251_v35 = vmax.f32 %v204_v32, 0.0 }
  0xa1   :  { %v254_v30 = vmax.f32 %v213_v25, 0.0 }
  0xa2   :  { %v242_v44 = vpop.f32.mrf.mxu3  ;;  %v227_v54 = vpop.f32.mrf.mxu2 }
  0xa3   :  { %v243_v58 = vadd.f32 %v242_v44, %v125_v43  ;;  %v228_v10 = vadd.f32 %v227_v54, %v100_v60 }
  0xa5   :  { %v264_v2 = vmax.f32 %v243_v58, 0.0  ;;  %v259_v17 = vmax.f32 %v228_v10, 0.0 }
  0xa6   :  { %v215_v18 = vpop.f32.mrf.mxu0 }
  0xa7   :  { %v216_v22 = vadd.f32 %v215_v18, %v80_v12 }
  0xa9   :  { %v255_v28 = vmax.f32 %v216_v22, 0.0 }
  0xaa   :  { %v245_v49 = vpop.f32.mrf.mxu3  ;;  %v230_v4 = vpop.f32.mrf.mxu2 }
  0xab   :  { %v246_v56 = vadd.f32 %v245_v49, %v130_v46  ;;  %v231_v8 = vadd.f32 %v230_v4, %v105_v52 }
  0xad   :  { %v265_v63 = vmax.f32 %v246_v56, 0.0  ;;  %v260_v14 = vmax.f32 %v231_v8, 0.0 }
  0xb2   :  { %v248_v55 = vpop.f32.mrf.mxu3 }
  0xb3   :  { %v249_v57 = vadd.f32 %v248_v55, %v135_v39 }
  0xb5   :  { %v266_v59 = vmax.f32 %v249_v57, 0.0 }
  0xb7   :  { %270 = vmatpush.msra.mxu1 %v266_v59 }
  0xb9   :  { %271 = vmatpush.msra.mxu1 %v265_v63 }
  0xbb   :  { %272 = vmatpush.msra.mxu1 %v264_v2 }
  0xbd   :  { %273 = vmatpush.msra.mxu1 %v263_v6 }
  0xbf   :  { %274 = vmatpush.msra.mxu1 %v262_v7 }
  0xc1   :  { %275 = vmatpush.msra.mxu1 %v261_v9 }
  0xc3   :  { %276 = vmatpush.msra.mxu1 %v260_v14 }
  0xc5   :  { %277 = vmatpush.msra.mxu1 %v259_v17 }
  0xc7   :  { %278 = vmatpush.msra.mxu1 %v258_v19 }
  0xc9   :  { %279 = vmatpush.msra.mxu1 %v257_v21 }
  0xcb   :  { %280 = vmatpush.msra.mxu1 %v256_v24 }
  0xcd   :  { %281 = vmatpush.msra.mxu1 %v255_v28 }
  0xcf   :  { %282 = vmatpush.msra.mxu1 %v254_v30 }
  0xd1   :  { %283 = vmatpush.msra.mxu1 %v253_v33 }
  0xd3   :  { %284 = vmatpush.msra.mxu1 %v252_v34 }
  0xd5   :  { %285 = vmatpush.msra.mxu1 %v251_v35 }
  0xd6   :  { %286 = vmatmul.f32.vlgmr.msra.gmra.mxu1 %v267_v36 }
 0x153   :  { %v287_v38 = vpop.f32.mrf.mxu1 }
 0x154   :  { %v288_v39 = vadd.f32 %v287_v38, %v269_v37 }
 0x156   :  { %290 = vst [vmem:[#allocation3] sm:$0x1] %v288_v39 }
 0x157   :  { %301 = dma.vmem_to_hbm [thread:$0]  %s297_s13, 16, %s299_s16, [#allocation4]  }
 0x158   :  { %358 = dma.done.wait [#allocation4], 16  }
 0x159   :  { %359 = vsyncadd [#allocation4], 4294967280 }
 0x15a   :  { %306 = vsyncpa [#allocation4], 1 }

</bundles_post_ra>
